<compile_context>
chip_gen: v7x
topology: tpu7x:2x2x1
jax: 0.10.0
libtpu: 0.0.40
codegen_flags: <defaults>
</compile_context>

<pallas_src>
import functools

import jax
import jax.numpy as jnp
from jax.experimental import pallas as pl
from jax.experimental.pallas import tpu as pltpu


def _decoder_kernel(ut_ref, vt_ref, wft_ref, wct_ref, o_ref, *, reps, nwd_pad):
    """One edge tile, edge dimension on the lane axis.

    ut_ref  : (D, tE)        user features for this tile (transposed)
    vt_ref  : (D, tE)        item features for this tile (transposed)
    wft_ref : (NWD_pad, D)   stacked basis weights, wft[i*D+d, k] = W_i[k, d]
    wct_ref : (C, NWD_pad)   classifier replicated along d, wct[c, i*D+d]=Wc[i,c]
    o_ref   : (C, tE)        output tile (lane-dense stores)
    """
    ut = ut_ref[...]                      # (D, tE) f32
    vt = vt_ref[...]                      # (D, tE) f32
    wft = wft_ref[...]                    # (NWD_pad, D)
    wct = wct_ref[...]                    # (C, NWD_pad)

    # All (u @ W_i) at once, transposed: t[i*D+d, e] = sum_k W_i[k, d] * u[e, k]
    t = jnp.dot(wft, ut, preferred_element_type=jnp.float32)   # (NWD_pad, tE)

    # Replicate item features across the NW stacked blocks (sublane tiling).
    v_rep = jnp.tile(vt, (reps, 1))
    if v_rep.shape[0] != nwd_pad:
        v_rep = v_rep[:nwd_pad, :]

    p = t * v_rep                                               # (NWD_pad, tE)

    # basis @ Wc folded into one K=NWD_pad matmul; padded rows contribute 0.
    out = jnp.dot(wct, p, preferred_element_type=jnp.float32)   # (C, tE)
    o_ref[...] = jnp.maximum(out, 0.0).astype(o_ref.dtype)      # ReLU


def decoder_forward(user_inputs, item_inputs, user_indices, item_indices,
                    weights, weight_classifier, *, edge_tile=512):
    """JAX wrapper reproducing Decoder.forward (dropout p=0.0 -> identity)."""
    assert edge_tile % 128 == 0, "edge_tile must be a multiple of 128"

    # TODO(synk): the per-edge row gather stays in XLA; fusing it in-kernel
    # (scalar-prefetched indices + resident node tables) would halve HBM
    # traffic but per-row dynamic gather has no robust Pallas lowering here.
    u = user_inputs[user_indices]               # (E, D)
    v = item_inputs[item_indices]               # (E, D)

    E, D = u.shape
    NW = weights.shape[0]
    C = weight_classifier.shape[1]

    # Pad edge count to a multiple of the tile; padded (zero) rows give
    # relu(0) = 0 and are sliced off below.
    E_pad = ((E + edge_tile - 1) // edge_tile) * edge_tile
    if E_pad != E:
        u = jnp.pad(u, ((0, E_pad - E), (0, 0)))
        v = jnp.pad(v, ((0, E_pad - E), (0, 0)))

    # Edge dimension on the lane axis -> lane-dense loads and stores.
    ut = u.T                                    # (D, E_pad)
    vt = v.T                                    # (D, E_pad)

    # Stacked basis weight and replicated classifier, zero-padded to a
    # lane-aligned contraction width (multiple of 128).
    nwd = NW * D
    nwd_pad = ((nwd + 127) // 128) * 128
    wft = jnp.transpose(weights, (0, 2, 1)).reshape(nwd, D)     # (NW*D, D)
    wct = jnp.repeat(weight_classifier.T, D, axis=1)            # (C, NW*D)
    if nwd_pad != nwd:
        wft = jnp.pad(wft, ((0, nwd_pad - nwd), (0, 0)))
        wct = jnp.pad(wct, ((0, 0), (0, nwd_pad - nwd)))

    reps = -(-nwd_pad // D)                     # ceil(nwd_pad / D)

    kernel = functools.partial(_decoder_kernel, reps=reps, nwd_pad=nwd_pad)

    out_t = pl.pallas_call(
        kernel,
        out_shape=jax.ShapeDtypeStruct((C, E_pad), jnp.float32),
        grid_spec=pltpu.PrefetchScalarGridSpec(
            num_scalar_prefetch=0,
            grid=(E_pad // edge_tile,),
            in_specs=[
                pl.BlockSpec((D, edge_tile), lambda e: (0, e)),      # u tile
                pl.BlockSpec((D, edge_tile), lambda e: (0, e)),      # v tile
                pl.BlockSpec((nwd_pad, D), lambda e: (0, 0)),        # Wf (full)
                pl.BlockSpec((C, nwd_pad), lambda e: (0, 0)),        # Wc (full)
            ],
            out_specs=pl.BlockSpec((C, edge_tile), lambda e: (0, e)),
        ),
        compiler_params=pltpu.CompilerParams(
            dimension_semantics=("parallel",),
            vmem_limit_bytes=32 * 1024 * 1024,
        ),
    )(ut, vt, wft, wct)

    return out_t[:, :E].T                       # back to (E, C)


# ---------------- deterministic parameter initialization ----------------

def init_params(key, input_dim, num_weights, num_classes):
    """Mirror Decoder.reset_parameters deterministically in JAX."""
    k_cls, *k_ws = jax.random.split(key, num_weights + 1)

    # xavier_uniform_ for weight_classifier (num_weights, num_classes)
    limit = jnp.sqrt(6.0 / (num_weights + num_classes))
    weight_classifier = jax.random.uniform(
        k_cls, (num_weights, num_classes), jnp.float32, -limit, limit)

    # orthogonal_ (gain=1.1) for each (input_dim, input_dim) basis weight
    ws = []
    for kw in k_ws:
        a = jax.random.normal(kw, (input_dim, input_dim), jnp.float32)
        q, r = jnp.linalg.qr(a)
        q = q * jnp.sign(jnp.diagonal(r))[None, :]   # make decomposition unique
        ws.append(1.1 * q)
    weights = jnp.stack(ws, axis=0)                  # (NW, D, D)
    return weights, weight_classifier


def reference_forward(user_inputs, item_inputs, user_indices, item_indices,
                      weights, weight_classifier):
    """Pure-JAX reference matching the PyTorch forward."""
    u = user_inputs[user_indices]
    v = item_inputs[item_indices]
    basis = jnp.stack(
        [jnp.sum((u @ weights[i]) * v, axis=1) for i in range(weights.shape[0])],
        axis=1)                                      # (E, NW)
    return jax.nn.relu(basis @ weight_classifier)    # (E, C)


if __name__ == "__main__":
    input_dim = 32
    num_weights = 4
    num_classes = 8
    num_users = 64
    num_items = 48
    num_edges = 1000   # not a multiple of the tile -> exercises edge padding

    key = jax.random.PRNGKey(0)
    k_u, k_i, k_ui, k_ii, k_p = jax.random.split(key, 5)

    user_inputs = jax.random.normal(k_u, (num_users, input_dim), jnp.float32)
    item_inputs = jax.random.normal(k_i, (num_items, input_dim), jnp.float32)
    user_indices = jax.random.randint(k_ui, (num_edges,), 0, num_users)
    item_indices = jax.random.randint(k_ii, (num_edges,), 0, num_items)

    weights, weight_classifier = init_params(
        k_p, input_dim, num_weights, num_classes)

    out = decoder_forward(user_inputs, item_inputs, user_indices, item_indices,
                          weights, weight_classifier, edge_tile=512)
    out = jax.block_until_ready(out)

    ref = reference_forward(user_inputs, item_inputs, user_indices,
                            item_indices, weights, weight_classifier)
    assert out.shape == (num_edges, num_classes)
    assert jnp.allclose(out, ref, atol=1e-3, rtol=1e-3), "mismatch vs reference"

    print("KERNEL_OK")
</pallas_src>

<mosaic_0001>
module attributes {stable_mosaic.version = 11 : i64} {
  func.func @_decoder_kernel(%arg0: i32, %arg1: memref<32x512xf32, #tpu.memory_space<vmem>>, %arg2: memref<32x512xf32, #tpu.memory_space<vmem>>, %arg3: memref<128x32xf32, #tpu.memory_space<vmem>>, %arg4: memref<8x128xf32, #tpu.memory_space<vmem>>, %arg5: memref<8x512xf32, #tpu.memory_space<vmem>>) attributes {dimension_semantics = [#tpu.dimension_semantics<parallel>], iteration_bounds = array<i64: 2>, scalar_prefetch = 0 : i64, scratch_operands = 0 : i64, tpu.core_type = #tpu.core_type<tc>, window_params = [{transform_indices = @transform_0, window_bounds = array<i64: 32, 512>}, {transform_indices = @transform_1, window_bounds = array<i64: 32, 512>}, {pipeline_mode = #tpu.pipeline_mode<synchronous>, transform_indices = @transform_2, window_bounds = array<i64: 128, 32>}, {pipeline_mode = #tpu.pipeline_mode<synchronous>, transform_indices = @transform_3, window_bounds = array<i64: 8, 128>}, {transform_indices = @transform_4, window_bounds = array<i64: 8, 512>}]} {
    %c0 = arith.constant 0 : index
    %c0_0 = arith.constant 0 : index
    %0 = vector.load %arg1[%c0, %c0_0] : memref<32x512xf32, #tpu.memory_space<vmem>>, vector<32x512xf32>
    %c0_1 = arith.constant 0 : index
    %c0_2 = arith.constant 0 : index
    %1 = vector.load %arg2[%c0_1, %c0_2] : memref<32x512xf32, #tpu.memory_space<vmem>>, vector<32x512xf32>
    %c0_3 = arith.constant 0 : index
    %c0_4 = arith.constant 0 : index
    %2 = vector.load %arg3[%c0_3, %c0_4] : memref<128x32xf32, #tpu.memory_space<vmem>>, vector<128x32xf32>
    %c0_5 = arith.constant 0 : index
    %c0_6 = arith.constant 0 : index
    %3 = vector.load %arg4[%c0_5, %c0_6] : memref<8x128xf32, #tpu.memory_space<vmem>>, vector<8x128xf32>
    %cst = arith.constant dense<0.000000e+00> : vector<128x512xf32>
    %4 = tpu.matmul %2, %0, %cst {dimension_numbers = #tpu.dot_dimension_numbers<[1], [0], [0], [1], [0, 0, 1, 1], [], []>} : vector<128x32xf32>, vector<32x512xf32>, vector<128x512xf32> -> vector<128x512xf32>
    %5 = tpu.concatenate %1, %1, %1, %1 in 0 : vector<32x512xf32>, vector<32x512xf32>, vector<32x512xf32>, vector<32x512xf32> -> vector<128x512xf32>
    %6 = arith.mulf %4, %5 : vector<128x512xf32>
    %cst_7 = arith.constant dense<0.000000e+00> : vector<8x512xf32>
    %7 = tpu.matmul %3, %6, %cst_7 {dimension_numbers = #tpu.dot_dimension_numbers<[1], [0], [0], [1], [0, 0, 1, 1], [], []>} : vector<8x128xf32>, vector<128x512xf32>, vector<8x512xf32> -> vector<8x512xf32>
    %cst_8 = arith.constant 0.000000e+00 : f32
    %8 = vector.broadcast %cst_8 : f32 to vector<8x512xf32>
    %9 = arith.maximumf %7, %8 : vector<8x512xf32>
    %c0_9 = arith.constant 0 : index
    %c0_10 = arith.constant 0 : index
    %10 = vector.load %arg5[%c0_9, %c0_10] : memref<8x512xf32, #tpu.memory_space<vmem>>, vector<8x512xf32>
    tpu.vector_store %arg5[%c0_9, %c0_10], %9 {strides = array<i32>} : memref<8x512xf32, #tpu.memory_space<vmem>>, vector<8x512xf32>,
    return
  }
  func.func @transform_0(%arg0: i32) -> (i32, i32) {
    %c0_i32 = arith.constant 0 : i32
    %c0_i32_0 = arith.constant 0 : i32
    return %c0_i32, %arg0 : i32, i32
  }
  func.func @transform_1(%arg0: i32) -> (i32, i32) {
    %c0_i32 = arith.constant 0 : i32
    %c0_i32_0 = arith.constant 0 : i32
    return %c0_i32, %arg0 : i32, i32
  }
  func.func @transform_2(%arg0: i32) -> (i32, i32) {
    %c0_i32 = arith.constant 0 : i32
    %c0_i32_0 = arith.constant 0 : i32
    %c0_i32_1 = arith.constant 0 : i32
    return %c0_i32, %c0_i32_0 : i32, i32
  }
  func.func @transform_3(%arg0: i32) -> (i32, i32) {
    %c0_i32 = arith.constant 0 : i32
    %c0_i32_0 = arith.constant 0 : i32
    %c0_i32_1 = arith.constant 0 : i32
    return %c0_i32, %c0_i32_0 : i32, i32
  }
  func.func @transform_4(%arg0: i32) -> (i32, i32) {
    %c0_i32 = arith.constant 0 : i32
    %c0_i32_0 = arith.constant 0 : i32
    return %c0_i32, %arg0 : i32, i32
  }
}

</mosaic_0001>

<bundles_post_ra>
// kernel: tpu_custom_call.1
= control target key start
LH: loop header
LB: loop body
LE: loop exit
PB: predicated region body
PF: predicated region fallthrough
CT: control target
= control target key end

     0   :  { %9 = vsyncpa [#allocation3], 0  ;;  %s1826_s0 = inlined_call_operand.hbm [shape: f32[32,1024], index: 0, kind: input, shape index: {}]   ;;  %s1827_s1 = inlined_call_operand.hbm [shape: f32[32,1024], index: 1, kind: input, shape index: {}]   ;;  %s1828_s2 = inlined_call_operand.vmem [shape: f32[128,32], index: 2, kind: input, shape index: {}]   ;;  %s1829_s3 = inlined_call_operand.vmem [shape: f32[8,128], index: 3, kind: input, shape index: {}]   ;;  %s1830_s4 = inlined_call_operand.hbm [shape: f32[8,1024], index: 4, kind: output, shape index: {}]  }
   0x1   :  { %11 = vsyncpa [#allocation3 + $0x1], 0 }
   0x2   :  { %12 = vsyncpa [#allocation6], 0 }
   0x3   :  { %14 = vsyncpa [#allocation6 + $0x1], 0 }
   0x4   :  { %15 = vsyncpa [#allocation4], 0 }
   0x5   :  { %17 = vsyncpa [#allocation4 + $0x1], 0  ;;  %s1353_s15 = smov 0   ;;  %s1355_s16 = smov 0  }
   0x6   :  { %s1357_s17 = smov 0   ;;  %s1359_s18 = smov 0  }
   0x7 LB: > { %s1374_s19 = sadd.s32 4294967295, %s1319_s18   ;;  %s1001_s20 = sadd.s32 4294967294, %s1319_s18   ;;  %s1319_s18 = sphi %s1359_s18, %s1849_s18   ;;  %s1315_s17 = sphi %s1357_s17, %s1848_s17   ;;  %s1311_s16 = sphi %s1355_s16, %s1847_s16   ;;  %s1307_s15 = sphi %s1353_s15, %s1846_s15  }
   0x8   : > { %s1378_s21 = sadd.s32 1, %s1319_s18   ;;  %s30_s22 = sadd.s32 1, %s1315_s17 }
   0x9   : > { %s27_s23 = ssub.s32 %s1319_s18, %s1378_s21  ;;  %p37_p0 = scmp.ne.s32.totalorder %s1315_s17, %s1311_s16 }
   0xa   : > { %p28_p1 = scmp.eq.s32.totalorder %s27_s23, 0  ;;  %p38_p2 = scmp.eq.s32.totalorder %s1319_s18, 0 }
   0xb   : > { %p43_p3 = scmp.ne.s32.totalorder %s1311_s16, %s1307_s15  ;;  %p44_p4 = scmp.eq.s32.totalorder %s1374_s19, 0 }
   0xc   : > { %s1390_s24 = scalar_select %p28_p1, %s1315_s17, %s30_s22  }
   0xd   : > { %p1392_p5 = por %p38_p2, %p37_p0  ;;  %p1396_p6 = por %p44_p4, %p43_p3 }
   0xe   : > { %p135_p7 = scmp.eq.s32.totalorder %s1374_s19, 1  ;;  %p141_p8 = scmp.eq.s32.totalorder %s1001_s20, 1 }
   0xf   : > { %s1835_s26 = scalar_select %p1396_p6, 1, 0 }
  0x10   : > { %p1151_p10 = scmp.lt.s32.totalorder %s1319_s18, 2  ;;  %p1403_p11 = por %p135_p7, %p37_p0 }
  0x11   : > { %p1407_p12 = por %p141_p8, %p43_p3  ;;  %s1412_s29 = sand.u32 1, %s1315_s17  }
  0x12   : > { %s1836_s27 = scalar_select %p1403_p11, 1, 0 }
  0x13   : > { %s1837_s28 = scalar_select %p1407_p12, 1, 0 }
  0x14   : > { %s1051_s30 = sshll.u32 %s1319_s18, 9  ;;  %s1004_s5 = sshll.u32 %s1412_s29, 7 }
  0x15   : > { %s1421_s8 = scalar_lea.hbm %s1826_s0, %s1051_s30  ;;  %s171_s9 = scalar_lea.vmem [#allocation2], %s1004_s5 }
  0x16   : > { %s178_s10 = sshll.u32 %s171_s9, 4  ;;  %p1427_p13 = pnand %p1151_p10, %p1392_p5  ;;  %s1431_s10 = int_to_ptr.vmem [resolvable:$true] %s178_s10 }
  0x17   : > { %s168_s12 = scalar_lea.sflag [#allocation3], %s1412_s29  ;;  %s1189_s13 = scalar_lea.hbm %s1421_s8, 2048 }
  0x18   : > { %p1190_p1 = scmp.ne.s32.totalorder %s1421_s8, %s1189_s13  ;;  %p1191_p2 = pneg %p1427_p13 }
  0x19   : > { %s1194_s22 = scalar_lea.hbm %s1826_s0, 4096  ;;  %p1195_p5 = scmp.lt.u32.totalorder %s1421_s8, %s1826_s0 }
  0x1a   : > { %p1192_p3 = pnand %p1191_p2, %p1190_p1  ;;  %p1196_p7 = scmp.lt.u32.totalorder %s1194_s22, %s1189_s13 }
  0x1b   : > { %p1198_p10 = scmp.lt.u32.totalorder %s1189_s13, %s1421_s8 }
  0x1c   : > { %p1193_p4 = pneg %p1192_p3  ;;  %p1197_p8 = por %p1196_p7, %p1195_p5 }
  0x1e   : > { %p1199_p9 = por %p1198_p10, %p1197_p8 }
  0x20   : > { %p1200_p0 = pnand %p1199_p9, %p1193_p4 }
  0x22   : > { %1203 = shalt.err (!%p1200_p0)
}
  0x23   : > { %s1204_s6 = scalar_lea.vmem %s1431_s10, 2048  ;;  %s1321_s7 = smov [#allocation2]  }
  0x24   : > { %p1205_p1 = scmp.ne.s32.totalorder %s1431_s10, %s1204_s6  ;;  %s1209_s9 = sshll.u32 %s1321_s7, 4  ;;  %s1210_s9 = int_to_ptr.vmem [resolvable:$false] %s1209_s9 }
  0x25   : > { %s1211_s14 = scalar_lea.vmem %s1210_s9, 4096  ;;  %p1212_p11 = scmp.lt.s32.totalorder %s1431_s10, %s1210_s9 }
  0x26   : > { %p1207_p3 = pnand %p1205_p1, %p1191_p2  ;;  %p1213_p5 = scmp.lt.s32.totalorder %s1211_s14, %s1204_s6 }
  0x28   : > { %p1208_p12 = pneg %p1207_p3  ;;  %p1214_p7 = por %p1213_p5, %p1212_p11 }
  0x2a   : > { %p1215_p8 = pnand %p1214_p7, %p1208_p12 }
  0x2c   : > { %1218 = shalt.err (!%p1215_p8)
}
  0x2d   : > { %s1832_s13 = smov 1024   ;;  %s1323_s20 = smov 512  }
  0x2e   : > { %s1324_s22 = smov 32   ;;  %p207_p9 = scmp.lt.s32.totalorder %s1319_s18, 3 }
  0x2f   : > { %1143 = dma.hbm_to_vmem [thread:$0]  (!%p1427_p13), %s1421_s8, 2048, %s1431_s10, %s168_s12, %s1832_s13, %s1323_s20, %s1324_s22  }
  0x30   : > { %s1471_s6 = scalar_lea.hbm %s1827_s1, %s1051_s30  ;;  %p1839_p11 = scmp.ge.s32.totalorder %s1319_s18, 1 }
  0x31   : > { %s192_s9 = scalar_lea.vmem [#allocation5], %s1004_s5  ;;  %s189_s8 = scalar_lea.sflag [#allocation6], %s1412_s29 }
  0x32   : > { %p1475_p12 = pnand %p1839_p11, %p207_p9  ;;  %s199_s14 = sshll.u32 %s192_s9, 4  ;;  %s1481_s14 = int_to_ptr.vmem [resolvable:$true] %s199_s14 }
  0x33   : > { %s1219_s10 = scalar_lea.hbm %s1471_s6, 2048  ;;  %s1224_s23 = scalar_lea.hbm %s1827_s1, 4096 }
  0x34   : > { %p1220_p0 = scmp.ne.s32.totalorder %s1471_s6, %s1219_s10  ;;  %p1225_p1 = scmp.lt.u32.totalorder %s1471_s6, %s1827_s1 }
  0x35   : > { %p1226_p3 = scmp.lt.u32.totalorder %s1224_s23, %s1219_s10  ;;  %p1228_p7 = scmp.lt.u32.totalorder %s1219_s10, %s1471_s6 }
  0x36   : > { %p1222_p4 = pnand %p1220_p0, %p1191_p2 }
  0x37   : > { %p1227_p5 = por %p1226_p3, %p1225_p1 }
  0x38   : > { %p1223_p10 = pneg %p1222_p4 }
  0x39   : > { %p1229_p8 = por %p1228_p7, %p1227_p5 }
  0x3b   : > { %p1230_p9 = pnand %p1229_p8, %p1223_p10 }
  0x3d   : > { %1233 = shalt.err (!%p1230_p9)
}
  0x3e   : > { %s1234_s5 = scalar_lea.vmem %s1481_s14, 2048  ;;  %s1325_s9 = smov [#allocation5]  }
  0x3f   : > { %p1235_p11 = scmp.ne.s32.totalorder %s1481_s14, %s1234_s5  ;;  %s1239_s30 = sshll.u32 %s1325_s9, 4  ;;  %s1240_s30 = int_to_ptr.vmem [resolvable:$false] %s1239_s30 }
  0x40   : > { %s1241_s13 = scalar_lea.vmem %s1240_s30, 4096  ;;  %p1242_p6 = scmp.lt.s32.totalorder %s1481_s14, %s1240_s30 }
  0x41   : > { %p1237_p0 = pnand %p1235_p11, %p1191_p2  ;;  %p1243_p1 = scmp.lt.s32.totalorder %s1241_s13, %s1234_s5 }
  0x43   : > { %p1238_p4 = pneg %p1237_p0  ;;  %p1244_p3 = por %p1243_p1, %p1242_p6 }
  0x45   : > { %p1245_p5 = pnand %p1244_p3, %p1238_p4 }
  0x47   : > { %1248 = shalt.err (!%p1245_p5)
}
  0x48   : > { %s1841_s10 = smov 1024   ;;  %211 = sbr.rel (%p1475_p12) target bundleno = 605 (0x25d), region = 36 }
  0x49   : > { %1146 = dma.hbm_to_vmem [thread:$0]  (!%p1427_p13), %s1471_s6, 2048, %s1481_s14, %s189_s8, %s1841_s10, %s1323_s20, %s1324_s22  }
  0x4a   : > { %s1515_s12 = sand.u32 (!%p1475_p12), 1, %s1311_s16   ;;  %p1842_p6 = scmp.ne.s32.totalorder (!%p1475_p12), %s1835_s26, 0 }
  0x4b   : > { %s1011_s23 = sshll.u32 (!%p1475_p12), %s1515_s12, 7  ;;  %s214_s25 = scalar_lea.sflag (!%p1475_p12), [#allocation3], %s1515_s12 }
  0x4c   : > { %s1519_s11 = scalar_lea.vmem (!%p1475_p12), [#allocation2], %s1011_s23 }
  0x4f   : > { %1294 = dma.done.wait (%p1842_p6), %s214_s25, 2048  }
  0x50   : > { %1296 = vsyncadd (%p1842_p6), %s214_s25, 4294965248  ;;  %s223_s29 = scalar_lea.sflag [#allocation6], %s1515_s12  ;;  %s1526_s20 = scalar_lea.vmem [#allocation5], %s1011_s23 }
  0x51   : > { %1298 = dma.done.wait (%p1842_p6), %s223_s29, 2048  }
  0x52   : > { %1300 = vsyncadd (%p1842_p6), %s223_s29, 4294965248  ;;  %v1326_v0 = vmov 0.0   ;;  %v260_v1 = vld [vmem:[%s1519_s11 + $0x8] sm:$0xff]  ;;  %v262_v3 = vld [vmem:[%s1519_s11 + $0x18] sm:$0xff]  ;;  %vm308_vm0 = vcmask 261120   ;;  %s1013_s7 = sshll.u32 %s1515_s12, 5 }
  0x53   : > { %421 = vmatprep.mubr.f32.mxu0 %v1326_v0  ;;  %582 = vmatprep.mubr.f32.mxu1 %v1326_v0  ;;  %v264_v2 = vld [vmem:[%s1519_s11 + $0x28] sm:$0xff]  ;;  %v266_v5 = vld [vmem:[%s1519_s11 + $0x38] sm:$0xff]  ;;  %v259_v6 = vld [vmem:[%s1519_s11] sm:$0xff]  ;;  %s1053_s14 = sshll.u32 %s1374_s19, 9  ;;  %s255_s8 = scalar_lea.vmem [#allocation7], %s1013_s7 }
  0x54   : > { %v1054_v4 = vpack.c.bf16 %v264_v2, %v260_v1  ;;  %v263_v7 = vld [vmem:[%s1519_s11 + $0x20] sm:$0xff]  ;;  %v1062_v8 = vpack.c.bf16 %v266_v5, %v262_v3  ;;  %v261_v10 = vld [vmem:[%s1519_s11 + $0x10] sm:$0xff]  ;;  %v268_v12 = vld [vmem:[%s1519_s11 + $0x48] sm:$0xff]  ;;  %s908_s5 = sshll.u32 %s255_s8, 4  ;;  %s1782_s13 = scalar_lea.hbm %s1830_s4, %s1053_s14  ;;  %s1784_s5 = int_to_ptr.vmem [resolvable:$true] %s908_s5 }
  0x55   : > { %v1056_v9 = vpack.c.bf16 %v263_v7, %v259_v6  ;;  %v265_v11 = vld [vmem:[%s1519_s11 + $0x30] sm:$0xff]  ;;  %v272_v14 = vld [vmem:[%s1519_s11 + $0x68] sm:$0xff]  ;;  %v270_v15 = vld [vmem:[%s1519_s11 + $0x58] sm:$0xff]  ;;  %s894_s19 = scalar_lea.sflag [#allocation4], %s1515_s12  ;;  %s1249_s10 = scalar_lea.vmem %s1784_s5, 512 }
  0x56   : > { %1055 = vmatprep.subr.bf16.mxu0 %v1054_v4  ;;  %v1064_v13 = vpack.c.bf16 %v265_v11, %v261_v10  ;;  %v274_v16 = vld [vmem:[%s1519_s11 + $0x78] sm:$0xff]  ;;  %1063 = vmatprep.subr.bf16.mxu1 %v1062_v8  ;;  %v1058_v17 = vpack.c.bf16 %v272_v14, %v268_v12  ;;  %v267_v19 = vld [vmem:[%s1519_s11 + $0x40] sm:$0xff]  ;;  %v269_v21 = vld [vmem:[%s1519_s11 + $0x50] sm:$0xff]  ;;  %p1250_p13 = scmp.ne.s32.totalorder %s1784_s5, %s1249_s10  ;;  %p1843_p2 = scmp.ne.s32.totalorder %s1836_s27, 0 }
  0x57   : > { %1057 = vmatpush1.bf16.msra.mxu0 %v1056_v9  ;;  %v1066_v18 = vpack.c.bf16 %v274_v16, %v270_v15  ;;  %v271_v20 = vld [vmem:[%s1519_s11 + $0x60] sm:$0xff]  ;;  %v273_v23 = vld [vmem:[%s1519_s11 + $0x70] sm:$0xff]  ;;  %v292_v26 = vld [vmem:[%s1828_s2 + $0x8] sm:$0xff]  ;;  %s1327_s23 = smov [#allocation7]  }
  0x58   : > { %1065 = vmatpush1.bf16.msra.mxu1 %v1064_v13  ;;  %v1060_v22 = vpack.c.bf16 %v271_v20, %v267_v19  ;;  %1059 = vmatprep.subr.bf16.mxu0 %v1058_v17  ;;  %v1068_v24 = vpack.c.bf16 %v273_v23, %v269_v21  ;;  %v291_v25 = vld [vmem:[%s1828_s2] sm:$0xff]  ;;  %v293_v27 = vld [vmem:[%s1828_s2 + $0x10] sm:$0xff]  ;;  %v294_v28 = vld [vmem:[%s1828_s2 + $0x18] sm:$0xff]  ;;  %p1251_p12 = pnand %p1250_p13, %p1843_p2  ;;  %s1253_s25 = sshll.u32 %s1327_s23, 4  ;;  %s1254_s25 = int_to_ptr.vmem [resolvable:$false] %s1253_s25 }
  0x59   : > { %1067 = vmatprep.subr.bf16.mxu1 %v1066_v18  ;;  %v295_v29 = vld [vmem:[%s1828_s2 + $0x20] sm:$0xff]  ;;  %v296_v30 = vld [vmem:[%s1828_s2 + $0x28] sm:$0xff]  ;;  %v297_v31 = vld [vmem:[%s1828_s2 + $0x30] sm:$0xff]  ;;  %s1255_s11 = scalar_lea.vmem %s1254_s25, 1024  ;;  %p1256_p7 = scmp.lt.s32.totalorder %s1784_s5, %s1254_s25 }
  0x5a   : > { %v298_v32 = vld [vmem:[%s1828_s2 + $0x38] sm:$0xff]  ;;  %v299_v33 = vld [vmem:[%s1828_s2 + $0x40] sm:$0xff]  ;;  %v300_v34 = vld [vmem:[%s1828_s2 + $0x48] sm:$0xff]  ;;  %p1252_p10 = pneg %p1251_p12  ;;  %p1257_p8 = scmp.lt.s32.totalorder %s1255_s11, %s1249_s10 }
  0x5b   : > { %1061 = vmatpush1.bf16.msra.mxu0 %v1060_v22  ;;  %v301_v35 = vld [vmem:[%s1828_s2 + $0x50] sm:$0xff]  ;;  %v302_v36 = vld [vmem:[%s1828_s2 + $0x58] sm:$0xff]  ;;  %v303_v37 = vld [vmem:[%s1828_s2 + $0x60] sm:$0xff] }
  0x5c   : > { %1069 = vmatpush1.bf16.msra.mxu1 %v1068_v24  ;;  %v304_v38 = vld [vmem:[%s1828_s2 + $0x68] sm:$0xff]  ;;  %v305_v39 = vld [vmem:[%s1828_s2 + $0x70] sm:$0xff]  ;;  %v306_v40 = vld [vmem:[%s1828_s2 + $0x78] sm:$0xff]  ;;  %p1258_p9 = por %p1257_p8, %p1256_p7 }
  0x5d   : > { %v1663_v44 = vld [vmem:[%s1526_s20] sm:$0xff]  ;;  %v1666_v45 = vld [vmem:[%s1526_s20 + $0x10] sm:$0xff]  ;;  %v1672_v48 = vld [vmem:[%s1526_s20 + $0x8] sm:$0xff] }
  0x5e   : > { %1014 = vmatmul.mubr.msk.f32.vlgmr.msra.gmra.mrb[0].mxu0 %vm308_vm0, %v291_v25  ;;  %v1669_v47 = vld [vmem:[%s1526_s20 + $0x20] sm:$0xff]  ;;  %v1675_v49 = vld [vmem:[%s1526_s20 + $0x30] sm:$0xff]  ;;  %v1678_v50 = vld [vmem:[%s1526_s20 + $0x28] sm:$0xff]  ;;  %p1259_p11 = pnand %p1258_p9, %p1252_p10 }
  0x5f   : > { %1030 = vmatmul.mubr.msk.f32.vlgmr.msra.gmra.mrb[0].mxu1 %vm308_vm0, %v291_v25  ;;  %427 = vmatprep.mubr.f32.mxu0 %v1326_v0  ;;  %v1681_v51 = vld [vmem:[%s1526_s20 + $0x18] sm:$0xff]  ;;  %v1695_v8 = vld [vmem:[%s1526_s20 + $0x40] sm:$0xff]  ;;  %v1698_v9 = vld [vmem:[%s1526_s20 + $0x50] sm:$0xff] }
  0x60   : > { %588 = vmatprep.mubr.f32.mxu1 %v1326_v0  ;;  %v1684_v53 = vld [vmem:[%s1526_s20 + $0x38] sm:$0xff]  ;;  %v1701_v11 = vld [vmem:[%s1526_s20 + $0x60] sm:$0xff]  ;;  %v1704_v12 = vld [vmem:[%s1526_s20 + $0x48] sm:$0xff] }
  0x61   : > { %v1707_v13 = vld [vmem:[%s1526_s20 + $0x70] sm:$0xff]  ;;  %v1710_v14 = vld [vmem:[%s1526_s20 + $0x68] sm:$0xff]  ;;  %v1713_v15 = vld [vmem:[%s1526_s20 + $0x58] sm:$0xff] }
  0x62   : > { %1015 = vmatmul.mubr.msk.f32.gmra.mrb[2].mxu0 %vm308_vm0, %v292_v26  ;;  %v1716_v17 = vld [vmem:[%s1526_s20 + $0x78] sm:$0xff] }
  0x63   : > { %1031 = vmatmul.mubr.msk.f32.gmra.mrb[2].mxu1 %vm308_vm0, %v292_v26  ;;  %433 = vmatprep.mubr.f32.mxu0 %v1326_v0 }
  0x64   : > { %594 = vmatprep.mubr.f32.mxu1 %v1326_v0 }
  0x66   : > { %1016 = vmatmul.mubr.msk.f32.gmra.mrb[4].mxu0 %vm308_vm0, %v293_v27 }
  0x67   : > { %1032 = vmatmul.mubr.msk.f32.gmra.mrb[4].mxu1 %vm308_vm0, %v293_v27  ;;  %439 = vmatprep.mubr.f32.mxu0 %v1326_v0 }
  0x68   : > { %600 = vmatprep.mubr.f32.mxu1 %v1326_v0 }
  0x6a   : > { %1017 = vmatmul.mubr.msk.f32.gmra.mrb[6].mxu0 %vm308_vm0, %v294_v28 }
  0x6b   : > { %1033 = vmatmul.mubr.msk.f32.gmra.mrb[6].mxu1 %vm308_vm0, %v294_v28  ;;  %445 = vmatprep.mubr.f32.mxu0 %v1326_v0 }
  0x6c   : > { %606 = vmatprep.mubr.f32.mxu1 %v1326_v0 }
  0x6e   : > { %1018 = vmatmul.mubr.msk.f32.gmra.mrb[8].mxu0 %vm308_vm0, %v295_v29 }
  0x6f   : > { %1034 = vmatmul.mubr.msk.f32.gmra.mrb[8].mxu1 %vm308_vm0, %v295_v29  ;;  %451 = vmatprep.mubr.f32.mxu0 %v1326_v0 }
  0x70   : > { %612 = vmatprep.mubr.f32.mxu1 %v1326_v0 }
  0x72   : > { %1019 = vmatmul.mubr.msk.f32.gmra.mrb[10].mxu0 %vm308_vm0, %v296_v30 }
  0x73   : > { %1035 = vmatmul.mubr.msk.f32.gmra.mrb[10].mxu1 %vm308_vm0, %v296_v30  ;;  %457 = vmatprep.mubr.f32.mxu0 %v1326_v0 }
  0x74   : > { %618 = vmatprep.mubr.f32.mxu1 %v1326_v0 }
  0x76   : > { %1020 = vmatmul.mubr.msk.f32.gmra.mrb[12].mxu0 %vm308_vm0, %v297_v31 }
  0x77   : > { %1036 = vmatmul.mubr.msk.f32.gmra.mrb[12].mxu1 %vm308_vm0, %v297_v31  ;;  %463 = vmatprep.mubr.f32.mxu0 %v1326_v0 }
  0x78   : > { %624 = vmatprep.mubr.f32.mxu1 %v1326_v0 }
  0x7a   : > { %1021 = vmatmul.mubr.msk.f32.gmra.mrb[14].mxu0 %vm308_vm0, %v298_v32 }
  0x7b   : > { %1037 = vmatmul.mubr.msk.f32.gmra.mrb[14].mxu1 %vm308_vm0, %v298_v32  ;;  %469 = vmatprep.mubr.f32.mxu0 %v1326_v0 }
  0x7c   : > { %630 = vmatprep.mubr.f32.mxu1 %v1326_v0 }
  0x7e   : > { %1022 = vmatmul.mubr.msk.f32.gmra.mrb[16].mxu0 %vm308_vm0, %v299_v33 }
  0x7f   : > { %1038 = vmatmul.mubr.msk.f32.gmra.mrb[16].mxu1 %vm308_vm0, %v299_v33  ;;  %475 = vmatprep.mubr.f32.mxu0 %v1326_v0 }
  0x80   : > { %636 = vmatprep.mubr.f32.mxu1 %v1326_v0 }
  0x82   : > { %1023 = vmatmul.mubr.msk.f32.gmra.mrb[18].mxu0 %vm308_vm0, %v300_v34 }
  0x83   : > { %1039 = vmatmul.mubr.msk.f32.gmra.mrb[18].mxu1 %vm308_vm0, %v300_v34  ;;  %481 = vmatprep.mubr.f32.mxu0 %v1326_v0 }
  0x84   : > { %642 = vmatprep.mubr.f32.mxu1 %v1326_v0 }
  0x86   : > { %1024 = vmatmul.mubr.msk.f32.gmra.mrb[20].mxu0 %vm308_vm0, %v301_v35 }
  0x87   : > { %1040 = vmatmul.mubr.msk.f32.gmra.mrb[20].mxu1 %vm308_vm0, %v301_v35  ;;  %487 = vmatprep.mubr.f32.mxu0 %v1326_v0 }
  0x88   : > { %648 = vmatprep.mubr.f32.mxu1 %v1326_v0 }
  0x8a   : > { %1025 = vmatmul.mubr.msk.f32.gmra.mrb[22].mxu0 %vm308_vm0, %v302_v36 }
  0x8b   : > { %1041 = vmatmul.mubr.msk.f32.gmra.mrb[22].mxu1 %vm308_vm0, %v302_v36  ;;  %493 = vmatprep.mubr.f32.mxu0 %v1326_v0 }
  0x8c   : > { %654 = vmatprep.mubr.f32.mxu1 %v1326_v0 }
  0x8e   : > { %1026 = vmatmul.mubr.msk.f32.gmra.mrb[24].mxu0 %vm308_vm0, %v303_v37 }
  0x8f   : > { %1042 = vmatmul.mubr.msk.f32.gmra.mrb[24].mxu1 %vm308_vm0, %v303_v37  ;;  %499 = vmatprep.mubr.f32.mxu0 %v1326_v0 }
  0x90   : > { %660 = vmatprep.mubr.f32.mxu1 %v1326_v0 }
  0x92   : > { %1027 = vmatmul.mubr.msk.f32.gmra.mrb[26].mxu0 %vm308_vm0, %v304_v38 }
  0x93   : > { %1043 = vmatmul.mubr.msk.f32.gmra.mrb[26].mxu1 %vm308_vm0, %v304_v38  ;;  %505 = vmatprep.mubr.f32.mxu0 %v1326_v0 }
  0x94   : > { %666 = vmatprep.mubr.f32.mxu1 %v1326_v0 }
  0x96   : > { %1028 = vmatmul.mubr.msk.f32.gmra.mrb[28].mxu0 %vm308_vm0, %v305_v39 }
  0x97   : > { %1044 = vmatmul.mubr.msk.f32.gmra.mrb[28].mxu1 %vm308_vm0, %v305_v39  ;;  %511 = vmatprep.mubr.f32.mxu0 %v1326_v0 }
  0x98   : > { %672 = vmatprep.mubr.f32.mxu1 %v1326_v0 }
  0x9a   : > { %1029 = vmatmul.mubr.msk.f32.gmra.mrb[30].mxu0 %vm308_vm0, %v306_v40 }
  0x9b   : > { %1045 = vmatmul.mubr.msk.f32.gmra.mrb[30].mxu1 %vm308_vm0, %v306_v40  ;;  %807 = vmatprep.mubr.f32.mxu0 %v1326_v0 }
  0x9c   : > { %878 = vmatprep.mubr.f32.mxu1 %v1326_v0 }
 0x131   : > { %v423_v41 = vpop.f32.mrb[0].mxu0 }
 0x132   : > { %v584_v42 = vpop.f32.mrb[0].mxu1  ;;  %v425_v43 = vpop.f32.mrb[1].mxu0  ;;  %v679_v54 = vmul.f32 %v423_v41, %v1663_v44 }
 0x133   : > { %v586_v46 = vpop.f32.mrb[1].mxu1  ;;  %v681_v58 = vmul.f32 %v584_v42, %v1666_v45  ;;  %v680_v59 = vmul.f32 %v425_v43, %v1672_v48 }
 0x134   : > { %v682_v63 = vmul.f32 %v586_v46, %v1681_v51 }
 0x135   : > { %v429_v52 = vpop.f32.mrb[2].mxu0 }
 0x136   : > { %v683_v55 = vmul.f32 %v429_v52, %v1669_v47  ;;  %v590_v56 = vpop.f32.mrb[2].mxu1  ;;  %v431_v57 = vpop.f32.mrb[3].mxu0 }
 0x137   : > { %v685_v60 = vmul.f32 %v590_v56, %v1675_v49  ;;  %v684_v61 = vmul.f32 %v431_v57, %v1678_v50  ;;  %v592_v62 = vpop.f32.mrb[3].mxu1 }
 0x138   : > { %v1072_v0 = vpack.c.bf16 %v683_v55, %v679_v54  ;;  %v686_v1 = vmul.f32 %v592_v62, %v1684_v53 }
 0x139   : > { %v1104_v2 = vpack.c.bf16 %v685_v60, %v681_v58  ;;  %v1070_v3 = vpack.c.bf16 %v684_v61, %v680_v59  ;;  %v435_v4 = vpop.f32.mrb[4].mxu0 }
 0x13a   : > { %v1102_v5 = vpack.c.bf16 %v686_v1, %v682_v63  ;;  %v596_v6 = vpop.f32.mrb[4].mxu1  ;;  %v437_v7 = vpop.f32.mrb[5].mxu0  ;;  %v687_v18 = vmul.f32 %v435_v4, %v1695_v8 }
 0x13b   : > { %v598_v10 = vpop.f32.mrb[5].mxu1  ;;  %1071 = vmatprep.subr.bf16.mxu0 %v1070_v3  ;;  %v689_v22 = vmul.f32 %v596_v6, %v1698_v9  ;;  %v688_v23 = vmul.f32 %v437_v7, %v1704_v12 }
 0x13c   : > { %1103 = vmatprep.subr.bf16.mxu1 %v1102_v5  ;;  %1073 = vmatpush1.bf16.msra.mxu0 %v1072_v0  ;;  %v690_v27 = vmul.f32 %v598_v10, %v1713_v15 }
 0x13d   : > { %1105 = vmatpush1.bf16.msra.mxu1 %v1104_v2  ;;  %v441_v16 = vpop.f32.mrb[6].mxu0 }
 0x13e   : > { %v691_v19 = vmul.f32 %v441_v16, %v1701_v11  ;;  %v602_v20 = vpop.f32.mrb[6].mxu1  ;;  %v443_v21 = vpop.f32.mrb[7].mxu0 }
 0x13f   : > { %v693_v24 = vmul.f32 %v602_v20, %v1707_v13  ;;  %v692_v25 = vmul.f32 %v443_v21, %v1710_v14  ;;  %v604_v26 = vpop.f32.mrb[7].mxu1 }
 0x140   : > { %v1076_v28 = vpack.c.bf16 %v691_v19, %v687_v18  ;;  %v694_v29 = vmul.f32 %v604_v26, %v1716_v17 }
 0x141   : > { %v1108_v30 = vpack.c.bf16 %v693_v24, %v689_v22  ;;  %v1074_v31 = vpack.c.bf16 %v692_v25, %v688_v23  ;;  %v447_v32 = vpop.f32.mrb[8].mxu0 }
 0x142   : > { %v1106_v33 = vpack.c.bf16 %v694_v29, %v690_v27  ;;  %v608_v34 = vpop.f32.mrb[8].mxu1  ;;  %v449_v35 = vpop.f32.mrb[9].mxu0  ;;  %v695_v38 = vmul.f32 %v447_v32, %v1663_v44 }
 0x143   : > { %v610_v36 = vpop.f32.mrb[9].mxu1  ;;  %1075 = vmatprep.subr.bf16.mxu0 %v1074_v31  ;;  %v697_v42 = vmul.f32 %v608_v34, %v1666_v45  ;;  %v696_v43 = vmul.f32 %v449_v35, %v1672_v48 }
 0x144   : > { %1107 = vmatprep.subr.bf16.mxu1 %v1106_v33  ;;  %1077 = vmatpush1.bf16.msra.mxu0 %v1076_v28  ;;  %v698_v55 = vmul.f32 %v610_v36, %v1681_v51 }
 0x145   : > { %1109 = vmatpush1.bf16.msra.mxu1 %v1108_v30  ;;  %v453_v37 = vpop.f32.mrb[10].mxu0 }
 0x146   : > { %v699_v39 = vmul.f32 %v453_v37, %v1669_v47  ;;  %v614_v40 = vpop.f32.mrb[10].mxu1  ;;  %v455_v41 = vpop.f32.mrb[11].mxu0 }
 0x147   : > { %v701_v46 = vmul.f32 %v614_v40, %v1675_v49  ;;  %v700_v52 = vmul.f32 %v455_v41, %v1678_v50  ;;  %v616_v54 = vpop.f32.mrb[11].mxu1 }
 0x148   : > { %v1080_v56 = vpack.c.bf16 %v699_v39, %v695_v38  ;;  %v702_v57 = vmul.f32 %v616_v54, %v1684_v53 }
 0x149   : > { %v1112_v58 = vpack.c.bf16 %v701_v46, %v697_v42  ;;  %v1078_v59 = vpack.c.bf16 %v700_v52, %v696_v43  ;;  %v459_v60 = vpop.f32.mrb[12].mxu0 }
 0x14a   : > { %v1110_v61 = vpack.c.bf16 %v702_v57, %v698_v55  ;;  %v620_v62 = vpop.f32.mrb[12].mxu1  ;;  %v461_v63 = vpop.f32.mrb[13].mxu0  ;;  %v703_v2 = vmul.f32 %v459_v60, %v1695_v8 }
 0x14b   : > { %v622_v0 = vpop.f32.mrb[13].mxu1  ;;  %1079 = vmatprep.subr.bf16.mxu0 %v1078_v59  ;;  %v705_v6 = vmul.f32 %v620_v62, %v1698_v9  ;;  %v704_v7 = vmul.f32 %v461_v63, %v1704_v12 }
 0x14c   : > { %1111 = vmatprep.subr.bf16.mxu1 %v1110_v61  ;;  %1081 = vmatpush1.bf16.msra.mxu0 %v1080_v56  ;;  %v706_v19 = vmul.f32 %v622_v0, %v1713_v15 }
 0x14d   : > { %1113 = vmatpush1.bf16.msra.mxu1 %v1112_v58  ;;  %v465_v1 = vpop.f32.mrb[14].mxu0 }
 0x14e   : > { %v707_v3 = vmul.f32 %v465_v1, %v1701_v11  ;;  %v626_v4 = vpop.f32.mrb[14].mxu1  ;;  %v467_v5 = vpop.f32.mrb[15].mxu0 }
 0x14f   : > { %v709_v10 = vmul.f32 %v626_v4, %v1707_v13  ;;  %v708_v16 = vmul.f32 %v467_v5, %v1710_v14  ;;  %v628_v18 = vpop.f32.mrb[15].mxu1 }
 0x150   : > { %v1084_v20 = vpack.c.bf16 %v707_v3, %v703_v2  ;;  %v710_v21 = vmul.f32 %v628_v18, %v1716_v17 }
 0x151   : > { %v1116_v22 = vpack.c.bf16 %v709_v10, %v705_v6  ;;  %v1082_v23 = vpack.c.bf16 %v708_v16, %v704_v7  ;;  %v471_v24 = vpop.f32.mrb[16].mxu0 }
 0x152   : > { %v1114_v25 = vpack.c.bf16 %v710_v21, %v706_v19  ;;  %v632_v26 = vpop.f32.mrb[16].mxu1  ;;  %v473_v27 = vpop.f32.mrb[17].mxu0  ;;  %v711_v30 = vmul.f32 %v471_v24, %v1663_v44 }
 0x153   : > { %v634_v28 = vpop.f32.mrb[17].mxu1  ;;  %1083 = vmatprep.subr.bf16.mxu0 %v1082_v23  ;;  %v713_v34 = vmul.f32 %v632_v26, %v1666_v45  ;;  %v712_v35 = vmul.f32 %v473_v27, %v1672_v48 }
 0x154   : > { %1115 = vmatprep.subr.bf16.mxu1 %v1114_v25  ;;  %1085 = vmatpush1.bf16.msra.mxu0 %v1084_v20  ;;  %v714_v39 = vmul.f32 %v634_v28, %v1681_v51 }
 0x155   : > { %1117 = vmatpush1.bf16.msra.mxu1 %v1116_v22  ;;  %v477_v29 = vpop.f32.mrb[18].mxu0 }
 0x156   : > { %v715_v31 = vmul.f32 %v477_v29, %v1669_v47  ;;  %v638_v32 = vpop.f32.mrb[18].mxu1  ;;  %v479_v33 = vpop.f32.mrb[19].mxu0 }
 0x157   : > { %v717_v36 = vmul.f32 %v638_v32, %v1675_v49  ;;  %v716_v37 = vmul.f32 %v479_v33, %v1678_v50  ;;  %v640_v38 = vpop.f32.mrb[19].mxu1 }
 0x158   : > { %v1088_v40 = vpack.c.bf16 %v715_v31, %v711_v30  ;;  %v718_v41 = vmul.f32 %v640_v38, %v1684_v53 }
 0x159   : > { %v1120_v42 = vpack.c.bf16 %v717_v36, %v713_v34  ;;  %v1086_v43 = vpack.c.bf16 %v716_v37, %v712_v35  ;;  %v483_v46 = vpop.f32.mrb[20].mxu0 }
 0x15a   : > { %v1118_v52 = vpack.c.bf16 %v718_v41, %v714_v39  ;;  %v644_v54 = vpop.f32.mrb[20].mxu1  ;;  %v485_v55 = vpop.f32.mrb[21].mxu0  ;;  %v719_v58 = vmul.f32 %v483_v46, %v1695_v8 }
 0x15b   : > { %v646_v56 = vpop.f32.mrb[21].mxu1  ;;  %1087 = vmatprep.subr.bf16.mxu0 %v1086_v43  ;;  %v721_v62 = vmul.f32 %v644_v54, %v1698_v9  ;;  %v720_v63 = vmul.f32 %v485_v55, %v1704_v12 }
 0x15c   : > { %1119 = vmatprep.subr.bf16.mxu1 %v1118_v52  ;;  %1089 = vmatpush1.bf16.msra.mxu0 %v1088_v40  ;;  %v722_v3 = vmul.f32 %v646_v56, %v1713_v15 }
 0x15d   : > { %1121 = vmatpush1.bf16.msra.mxu1 %v1120_v42  ;;  %v489_v57 = vpop.f32.mrb[22].mxu0 }
 0x15e   : > { %v723_v59 = vmul.f32 %v489_v57, %v1701_v11  ;;  %v650_v60 = vpop.f32.mrb[22].mxu1  ;;  %v491_v61 = vpop.f32.mrb[23].mxu0 }
 0x15f   : > { %v725_v0 = vmul.f32 %v650_v60, %v1707_v13  ;;  %v724_v1 = vmul.f32 %v491_v61, %v1710_v14  ;;  %v652_v2 = vpop.f32.mrb[23].mxu1 }
 0x160   : > { %v1092_v4 = vpack.c.bf16 %v723_v59, %v719_v58  ;;  %v726_v5 = vmul.f32 %v652_v2, %v1716_v17 }
 0x161   : > { %v1124_v6 = vpack.c.bf16 %v725_v0, %v721_v62  ;;  %v1090_v7 = vpack.c.bf16 %v724_v1, %v720_v63  ;;  %v495_v10 = vpop.f32.mrb[24].mxu0 }
 0x162   : > { %v1122_v16 = vpack.c.bf16 %v726_v5, %v722_v3  ;;  %v656_v18 = vpop.f32.mrb[24].mxu1  ;;  %v497_v19 = vpop.f32.mrb[25].mxu0  ;;  %v727_v22 = vmul.f32 %v495_v10, %v1663_v44 }
 0x163   : > { %v658_v20 = vpop.f32.mrb[25].mxu1  ;;  %1091 = vmatprep.subr.bf16.mxu0 %v1090_v7  ;;  %v729_v26 = vmul.f32 %v656_v18, %v1666_v45  ;;  %v728_v27 = vmul.f32 %v497_v19, %v1672_v48 }
 0x164   : > { %1123 = vmatprep.subr.bf16.mxu1 %v1122_v16  ;;  %1093 = vmatpush1.bf16.msra.mxu0 %v1092_v4  ;;  %v730_v31 = vmul.f32 %v658_v20, %v1681_v51 }
 0x165   : > { %1125 = vmatpush1.bf16.msra.mxu1 %v1124_v6  ;;  %v501_v21 = vpop.f32.mrb[26].mxu0 }
 0x166   : > { %v731_v23 = vmul.f32 %v501_v21, %v1669_v47  ;;  %v662_v24 = vpop.f32.mrb[26].mxu1  ;;  %v503_v25 = vpop.f32.mrb[27].mxu0 }
 0x167   : > { %v733_v28 = vmul.f32 %v662_v24, %v1675_v49  ;;  %v732_v29 = vmul.f32 %v503_v25, %v1678_v50  ;;  %v664_v30 = vpop.f32.mrb[27].mxu1 }
 0x168   : > { %v1096_v32 = vpack.c.bf16 %v731_v23, %v727_v22  ;;  %v734_v33 = vmul.f32 %v664_v30, %v1684_v53 }
 0x169   : > { %v1128_v34 = vpack.c.bf16 %v733_v28, %v729_v26  ;;  %v1094_v44 = vpack.c.bf16 %v732_v29, %v728_v27  ;;  %v507_v35 = vpop.f32.mrb[28].mxu0 }
 0x16a   : > { %v1126_v47 = vpack.c.bf16 %v734_v33, %v730_v31  ;;  %v668_v36 = vpop.f32.mrb[28].mxu1  ;;  %v509_v37 = vpop.f32.mrb[29].mxu0  ;;  %v735_v48 = vmul.f32 %v507_v35, %v1695_v8 }
 0x16b   : > { %v670_v38 = vpop.f32.mrb[29].mxu1  ;;  %1095 = vmatprep.subr.bf16.mxu0 %v1094_v44  ;;  %v737_v53 = vmul.f32 %v668_v36, %v1698_v9  ;;  %v736_v39 = vmul.f32 %v509_v37, %v1704_v12  ;;  %v307_v9 = vld [vmem:[%s1829_s3] sm:$0xff] }
 0x16c   : > { %1127 = vmatprep.subr.bf16.mxu1 %v1126_v47  ;;  %1097 = vmatpush1.bf16.msra.mxu0 %v1096_v32  ;;  %v738_v43 = vmul.f32 %v670_v38, %v1713_v15 }
 0x16d   : > { %1129 = vmatpush1.bf16.msra.mxu1 %v1128_v34  ;;  %v513_v45 = vpop.f32.mrb[30].mxu0 }
 0x16e   : > { %v739_v49 = vmul.f32 %v513_v45, %v1701_v11  ;;  %v674_v50 = vpop.f32.mrb[30].mxu1  ;;  %v515_v51 = vpop.f32.mrb[31].mxu0 }
 0x16f   : > { %v741_v40 = vmul.f32 %v674_v50, %v1707_v13  ;;  %v740_v41 = vmul.f32 %v515_v51, %v1710_v14  ;;  %v676_v42 = vpop.f32.mrb[31].mxu1 }
 0x170   : > { %v1100_v46 = vpack.c.bf16 %v739_v49, %v735_v48  ;;  %v742_v8 = vmul.f32 %v676_v42, %v1716_v17 }
 0x171   : > { %v1132_v52 = vpack.c.bf16 %v741_v40, %v737_v53  ;;  %v1098_v11 = vpack.c.bf16 %v740_v41, %v736_v39 }
 0x172   : > { %v1130_v54 = vpack.c.bf16 %v742_v8, %v738_v43 }
 0x173   : > { %1099 = vmatprep.subr.bf16.mxu0 %v1098_v11 }
 0x174   : > { %1131 = vmatprep.subr.bf16.mxu1 %v1130_v54  ;;  %1101 = vmatpush1.bf16.msra.mxu0 %v1100_v46 }
 0x175   : > { %1133 = vmatpush1.bf16.msra.mxu1 %v1132_v52 }
 0x177   : > { %808 = vmatmul.mubr.f32.vlgmr.msra.gmra.mrb[32].mxu0 %v307_v9 }
 0x178   : > { %879 = vmatmul.mubr.f32.vlgmr.msra.gmra.mrb[32].mxu1 %v307_v9 }
 0x24a   : > { %v809_v12 = vpop.f32.mrb[32].mxu0 }
 0x24b   : > { %v885_v13 = vmax.f32 %v809_v12, 0.0  ;;  %v880_v14 = vpop.f32.mrb[32].mxu1  ;;  %v811_v15 = vpop.f32.mrb[33].mxu0 }
 0x24c   : > { %v887_v17 = vmax.f32 %v880_v14, 0.0  ;;  %v886_v55 = vmax.f32 %v811_v15, 0.0  ;;  %v882_v56 = vpop.f32.mrb[33].mxu1 }
 0x24d   : > { %889 = vst [vmem:[%s255_s8] sm:$0xff] %v885_v13  ;;  %v888_v57 = vmax.f32 %v882_v56, 0.0 }
 0x24e   : > { %891 = vst [vmem:[%s255_s8 + $0x10] sm:$0xff] %v887_v17  ;;  %890 = vst [vmem:[%s255_s8 + $0x8] sm:$0xff] %v886_v55 }
 0x24f   : > { %892 = vst [vmem:[%s255_s8 + $0x18] sm:$0xff] %v888_v57 }
 0x250   : > { %1262 = shalt.err (!%p1259_p11)
}
 0x251   : > { %s1263_s12 = scalar_lea.hbm %s1782_s13, 512  ;;  %s1267_s22 = scalar_lea.hbm %s1830_s4, 1024 }
 0x252   : > { %p1264_p0 = scmp.ne.s32.totalorder %s1782_s13, %s1263_s12  ;;  %p1268_p3 = scmp.lt.u32.totalorder %s1782_s13, %s1830_s4 }
 0x253   : > { %p1269_p5 = scmp.lt.u32.totalorder %s1267_s22, %s1263_s12  ;;  %p1271_p13 = scmp.lt.u32.totalorder %s1263_s12, %s1782_s13 }
 0x254   : > { %p1265_p4 = pnand %p1264_p0, %p1843_p2 }
 0x255   : > { %p1270_p6 = por %p1269_p5, %p1268_p3 }
 0x256   : > { %p1266_p1 = pneg %p1265_p4 }
 0x257   : > { %p1272_p12 = por %p1271_p13, %p1270_p6 }
 0x259   : > { %p1273_p10 = pnand %p1272_p12, %p1266_p1 }
 0x25b   : > { %1276 = shalt.err (!%p1273_p10)
}
 0x25c   : > { %1138 = dma.vmem_to_hbm [thread:$0]  (%p1843_p2), %s1784_s5, 512, %s1782_s13, %s894_s19  }
 0x25d PF: > { %s920_s7 = sand.u32 1, %s1307_s15   ;;  %p1844_p7 = scmp.ne.s32.totalorder %s1837_s28, 0 }
 0x25e   : > { %p1845_p8 = scmp.ge.s32.totalorder %s1319_s18, 2  ;;  %s921_s14 = scalar_lea.sflag [#allocation4], %s920_s7 }
 0x260   : > { %p1148_p9 = pnand %p1845_p8, %p1844_p7 }
 0x262   : > { %1302 = dma.done.wait (!%p1148_p9), %s921_s14, 512  }
 0x263   : > { %1304 = vsyncadd (!%p1148_p9), %s921_s14, 4294966784  ;;  %p20_p11 = scmp.ge.s32.totalorder %s1378_s21, 4   ;;  %s1846_s15 = smov %s1311_s16 }
 0x264   : > { %s1847_s16 = smov %s1315_s17  ;;  %s1848_s17 = smov %s1390_s24 }
 0x265   : > { %s1849_s18 = smov %s1378_s21  ;;  %22 = sbr.rel (!%p20_p11) target bundleno = 7 (0x7), region = 94 }
 0x26c   :  { %926 = vsyncpa [#allocation3], 1 }
 0x26d   :  { %928 = vsyncpa [#allocation3 + $0x1], 1 }
 0x26e   :  { %929 = vsyncpa [#allocation6], 1 }
 0x26f   :  { %931 = vsyncpa [#allocation6 + $0x1], 1 }
 0x270   :  { %932 = vsyncpa [#allocation4], 1 }
 0x271   :  { %934 = vsyncpa [#allocation4 + $0x1], 1 }

</bundles_post_ra>
